<compile_context>
chip_gen: v7x
topology: tpu7x:2x2x1
jax: 0.10.0
libtpu: 0.0.40
codegen_flags: <defaults>
</compile_context>

<pallas_src>
import functools

import jax
import jax.numpy as jnp
from jax import lax
from jax.experimental import pallas as pl
from jax.experimental.pallas import tpu as pltpu


def _textual_attention_kernel(q_ref, c_ref, o_ref, m_sc, l_sc, acc_sc, *,
                              lc_total):
    # q_ref: (TB, Lq, D), c_ref: (TB, TLC, D), o_ref: (TB, D)
    lci = pl.program_id(1)
    nlc = pl.num_programs(1)
    tlc = c_ref.shape[1]

    @pl.when(lci == 0)
    def _init():
        m_sc[...] = jnp.full_like(m_sc, -jnp.inf)
        l_sc[...] = jnp.zeros_like(l_sc)
        acc_sc[...] = jnp.zeros_like(acc_sc)

    q = q_ref[...]                     # native dtype straight to the MXU
    c = c_ref[...]

    # S^T tile: per-batch q @ c^T, contracting D (no explicit transpose).
    st = jnp.einsum("bqd,bkd->bqk", q, c,
                    preferred_element_type=jnp.float32)     # (TB, Lq, TLC) f32

    # torch.max(S, dim=2)[0] == max over Lq of S^T.
    m_tile = jnp.max(st, axis=1)                            # (TB, TLC) f32

    c32 = c.astype(jnp.float32)
    if lc_total % tlc != 0:
        # Partial last Lc tile: mask out-of-range context rows so they add
        # nothing to the softmax denominator or the weighted sum.
        pos = lci * tlc + lax.broadcasted_iota(jnp.int32, m_tile.shape, 1)
        valid = pos < lc_total
        m_tile = jnp.where(valid, m_tile, -jnp.inf)
        c32 = jnp.where(valid[:, :, None], c32, 0.0)

    # Online softmax over the Lc axis (exact when there is a single tile).
    m_prev = m_sc[...]                                      # (TB, 1)
    m_new = jnp.maximum(m_prev, jnp.max(m_tile, axis=1, keepdims=True))
    alpha = jnp.exp(m_prev - m_new)                         # (TB, 1)
    p = jnp.exp(m_tile - m_new)                             # (TB, TLC) f32

    l_sc[...] = alpha * l_sc[...] + jnp.sum(p, axis=1, keepdims=True)
    # Weighted sum on the VPU (avoids an M=1 MXU matmul); attn stays f32.
    acc_sc[...] = alpha * acc_sc[...] + jnp.sum(p[:, :, None] * c32, axis=1)
    m_sc[...] = m_new

    @pl.when(lci == nlc - 1)
    def _finalize():
        inv = pl.reciprocal(l_sc[...], approx=False)        # exact -> matches ref
        # Single lane/sublane-dense (TB, D) store.
        o_ref[...] = (acc_sc[...] * inv).astype(o_ref.dtype)


def _legalize_tile(t, total):
    """Clamp tile to [1, total] and force multiple-of-8 or == total."""
    t = max(1, min(int(t), total))
    if t != total and t % 8 != 0:
        t = min(total, max(8, (t // 8) * 8))
        if t % 8 != 0:          # only possible when total < 8
            t = total
    return t


def _pick_tile(total, per_unit_bytes, target_bytes):
    """Largest tile (multiple of 8, or == total) fitting the byte target.
    Prefers tiles that divide `total` (avoids partial boundary blocks)."""
    cap = target_bytes // max(1, per_unit_bytes)
    if total <= 8 or cap >= total:
        return total
    cap = int(max(8, (cap // 8) * 8))
    start = min(cap, (total // 8) * 8)
    for t in range(start, 7, -8):
        if total % t == 0:
            return t
    return min(cap, total)


@functools.partial(jax.jit, static_argnames=("tb", "lc_tile"))
def textual_attention(query, context, *, tb=None, lc_tile=None):
    """query: (B, Lq, D), context: (B, Lc, D) -> (B, 1, D)."""
    B, Lq, D = query.shape
    Bc, Lc, Dc = context.shape
    assert B == Bc and D == Dc, "batch / feature dims must match"

    isz = jnp.dtype(query.dtype).itemsize
    target = 2 * 2**20                      # ~2 MiB of inputs per grid step

    # --- Lc tile (context streaming only when a minimal fold overflows) ---
    tb_req = None if tb is None else _legalize_tile(tb, B)
    tb_probe = tb_req if tb_req is not None else min(8, B)
    if lc_tile is not None:
        tlc = _legalize_tile(lc_tile, Lc)
    elif tb_probe * (Lq + Lc) * D * isz <= target:
        tlc = Lc                            # whole context rows per step
    else:
        tlc = _legalize_tile(_pick_tile(Lc, tb_probe * D * isz, target), Lc)

    # --- batch tile (multiple of 8 or == B; no wrapper-level padding) ---
    if tb_req is not None:
        tb_ = tb_req
    else:
        per_batch = (Lq + tlc) * D * isz
        tb_ = _pick_tile(B, per_batch, target)
        if tb_ == B and B >= 16 and B % 16 == 0:
            # Keep >= 2 steps on the "parallel" batch axis so both v7x
            # TensorCores get work (harmless on 1-TC v5e/v6e).
            tb_ = B // 2
    tb_ = _legalize_tile(tb_, B)

    num_b = pl.cdiv(B, tb_)
    num_lc = pl.cdiv(Lc, tlc)

    # --- scoped-VMEM budget (inputs double-buffered + f32 intermediates) ---
    est = (2 * tb_ * (Lq + tlc) * D * isz       # double-buffered input blocks
           + 2 * tb_ * D * isz                  # double-buffered output block
           + tb_ * Lq * tlc * 4                 # f32 score tile
           + 2 * tb_ * tlc * D * 4              # f32 context upcast + product
           + tb_ * (D + 16) * 4)                # accumulators / softmax temps
    try:
        vmem_cap = int(pltpu.get_tpu_info().vmem_capacity_bytes)
    except Exception:
        vmem_cap = 64 * 2**20
    limit_cap = min(48 * 2**20, (vmem_cap * 5) // 8)   # ~40 MiB on v7x
    extra = {}
    if est > 12 * 2**20:
        extra["vmem_limit_bytes"] = int(min(limit_cap, max(2 * est, 16 * 2**20)))

    kernel = functools.partial(_textual_attention_kernel, lc_total=Lc)

    out2d = pl.pallas_call(
        kernel,
        out_shape=jax.ShapeDtypeStruct((B, D), query.dtype),
        grid_spec=pltpu.PrefetchScalarGridSpec(
            num_scalar_prefetch=0,
            grid=(num_b, num_lc),
            in_specs=[
                pl.BlockSpec((tb_, Lq, D), lambda b, l: (b, 0, 0)),
                pl.BlockSpec((tb_, tlc, D), lambda b, l: (b, l, 0)),
            ],
            out_specs=pl.BlockSpec((tb_, D), lambda b, l: (b, 0)),
            scratch_shapes=[
                pltpu.VMEM((tb_, 1), jnp.float32),   # running max
                pltpu.VMEM((tb_, 1), jnp.float32),   # running denom
                pltpu.VMEM((tb_, D), jnp.float32),   # output accumulator
            ]),
        compiler_params=pltpu.CompilerParams(
            dimension_semantics=("parallel", "arbitrary"), **extra),
    )(query, context)

    return out2d[:, None, :]


if __name__ == "__main__":
    key = jax.random.PRNGKey(0)

    def reference(query, context):
        S = jnp.einsum("bld,bqd->blq", context, query)       # bmm(context, q^T)
        attn = jax.nn.softmax(jnp.max(S, axis=2), axis=-1)   # (B, Lc)
        return jnp.einsum("bl,bld->bd", attn, context)[:, None, :]

    cases = [
        dict(shape=(8, 8, 16, 128)),               # dense fast path, one step
        dict(shape=(2, 8, 8, 32)),                 # tiny, full-block path
        dict(shape=(10, 4, 24, 64)),               # B not multiple of 8 -> tb == B
        dict(shape=(8, 4, 48, 128), lc_tile=16),   # forced Lc streaming (even split)
        dict(shape=(8, 4, 40, 64), lc_tile=16),    # Lc streaming, partial last tile
    ]
    for case in cases:
        B, Lq, Lc, D = case["shape"]
        key, kq, kc = jax.random.split(key, 3)
        q = jax.random.normal(kq, (B, Lq, D), dtype=jnp.float32)
        c = jax.random.normal(kc, (B, Lc, D), dtype=jnp.float32)

        out = textual_attention(q, c, lc_tile=case.get("lc_tile"))
        jax.block_until_ready(out)

        ref = reference(q, c)
        assert out.shape == (B, 1, D), (out.shape, (B, 1, D))
        assert jnp.allclose(out, ref, atol=1e-4, rtol=1e-4), \
            f"mismatch for case {case}"

    print("KERNEL_OK")
</pallas_src>

<mosaic_0001>
module attributes {stable_mosaic.version = 11 : i64} {
  func.func @_textual_attention_kernel(%arg0: i32, %arg1: i32, %arg2: memref<8x8x128xf32, #tpu.memory_space<vmem>>, %arg3: memref<8x16x128xf32, #tpu.memory_space<vmem>>, %arg4: memref<8x128xf32, #tpu.memory_space<vmem>>, %arg5: memref<8x1xf32, #tpu.memory_space<vmem>>, %arg6: memref<8x1xf32, #tpu.memory_space<vmem>>, %arg7: memref<8x128xf32, #tpu.memory_space<vmem>>) attributes {dimension_semantics = [#tpu.dimension_semantics<parallel>, #tpu.dimension_semantics<arbitrary>], iteration_bounds = array<i64: 1, 1>, scalar_prefetch = 0 : i64, scratch_operands = 3 : i64, tpu.core_type = #tpu.core_type<tc>, window_params = [{transform_indices = @transform_0, window_bounds = array<i64: 8, 8, 128>}, {transform_indices = @transform_1, window_bounds = array<i64: 8, 16, 128>}, {transform_indices = @transform_2, window_bounds = array<i64: 8, 128>}]} {
    %c0_i32 = arith.constant 0 : i32
    %0 = arith.cmpi eq, %arg1, %c0_i32 : i32
    %1 = arith.extui %0 : i1 to i32
    %c0_i32_0 = arith.constant 0 : i32
    %2 = arith.cmpi ne, %1, %c0_i32_0 : i32
    scf.if %2 {
      %cst_24 = arith.constant 0xFF800000 : f32
      %35 = vector.broadcast %cst_24 : f32 to vector<8x1xf32>
      %c0_25 = arith.constant 0 : index
      %c0_26 = arith.constant 0 : index
      %36 = vector.load %arg5[%c0_25, %c0_26] : memref<8x1xf32, #tpu.memory_space<vmem>>, vector<8x1xf32>
      tpu.vector_store %arg5[%c0_25, %c0_26], %35 {strides = array<i32>} : memref<8x1xf32, #tpu.memory_space<vmem>>, vector<8x1xf32>,
      %cst_27 = arith.constant 0.000000e+00 : f32
      %37 = vector.broadcast %cst_27 : f32 to vector<8x1xf32>
      %c0_28 = arith.constant 0 : index
      %c0_29 = arith.constant 0 : index
      %38 = vector.load %arg6[%c0_28, %c0_29] : memref<8x1xf32, #tpu.memory_space<vmem>>, vector<8x1xf32>
      tpu.vector_store %arg6[%c0_28, %c0_29], %37 {strides = array<i32>} : memref<8x1xf32, #tpu.memory_space<vmem>>, vector<8x1xf32>,
      %cst_30 = arith.constant 0.000000e+00 : f32
      %39 = vector.broadcast %cst_30 : f32 to vector<8x128xf32>
      %c0_31 = arith.constant 0 : index
      %c0_32 = arith.constant 0 : index
      %40 = vector.load %arg7[%c0_31, %c0_32] : memref<8x128xf32, #tpu.memory_space<vmem>>, vector<8x128xf32>
      tpu.vector_store %arg7[%c0_31, %c0_32], %39 {strides = array<i32>} : memref<8x128xf32, #tpu.memory_space<vmem>>, vector<8x128xf32>,
    } else {
    }
    %c0 = arith.constant 0 : index
    %c0_1 = arith.constant 0 : index
    %c0_2 = arith.constant 0 : index
    %3 = vector.load %arg2[%c0, %c0_1, %c0_2] : memref<8x8x128xf32, #tpu.memory_space<vmem>>, vector<8x8x128xf32>
    %c0_3 = arith.constant 0 : index
    %c0_4 = arith.constant 0 : index
    %c0_5 = arith.constant 0 : index
    %4 = vector.load %arg3[%c0_3, %c0_4, %c0_5] : memref<8x16x128xf32, #tpu.memory_space<vmem>>, vector<8x16x128xf32>
    "tpu.trace_start"() <{level = 10 : i32, message = "bqd,bkd->bqk"}> : () -> ()
    %cst = arith.constant dense<0.000000e+00> : vector<8x8x16xf32>
    %5 = tpu.matmul %3, %4, %cst {dimension_numbers = #tpu.dot_dimension_numbers<[2], [2], [1], [1], [0, 0, 0, 1, 1, 1], [0], [0]>} : vector<8x8x128xf32>, vector<8x16x128xf32>, vector<8x8x16xf32> -> vector<8x8x16xf32>
    "tpu.trace_stop"() : () -> ()
    %cst_6 = arith.constant dense<0xFF800000> : vector<8x16xf32>
    %6 = vector.multi_reduction <maximumf>, %5, %cst_6 [1] : vector<8x8x16xf32> to vector<8x16xf32>
    %c0_7 = arith.constant 0 : index
    %c0_8 = arith.constant 0 : index
    %7 = vector.load %arg5[%c0_7, %c0_8] : memref<8x1xf32, #tpu.memory_space<vmem>>, vector<8x1xf32>
    %cst_9 = arith.constant dense<0xFF800000> : vector<8xf32>
    %8 = vector.multi_reduction <maximumf>, %6, %cst_9 [1] : vector<8x16xf32> to vector<8xf32>
    %9 = vector.shape_cast %8 : vector<8xf32> to vector<8x1xf32>
    %10 = arith.maximumf %7, %9 : vector<8x1xf32>
    %11 = arith.subf %7, %10 : vector<8x1xf32>
    %12 = math.exp %11 : vector<8x1xf32>
    %13 = vector.broadcast %10 : vector<8x1xf32> to vector<8x16xf32>
    %14 = arith.subf %6, %13 : vector<8x16xf32>
    %15 = math.exp %14 : vector<8x16xf32>
    %c0_10 = arith.constant 0 : index
    %c0_11 = arith.constant 0 : index
    %16 = vector.load %arg6[%c0_10, %c0_11] : memref<8x1xf32, #tpu.memory_space<vmem>>, vector<8x1xf32>
    %17 = arith.mulf %12, %16 : vector<8x1xf32>
    %cst_12 = arith.constant dense<0.000000e+00> : vector<8xf32>
    %18 = vector.multi_reduction <add>, %15, %cst_12 [1] : vector<8x16xf32> to vector<8xf32>
    %19 = vector.shape_cast %18 : vector<8xf32> to vector<8x1xf32>
    %20 = arith.addf %17, %19 : vector<8x1xf32>
    %c0_13 = arith.constant 0 : index
    %c0_14 = arith.constant 0 : index
    %21 = vector.load %arg6[%c0_13, %c0_14] : memref<8x1xf32, #tpu.memory_space<vmem>>, vector<8x1xf32>
    tpu.vector_store %arg6[%c0_13, %c0_14], %20 {strides = array<i32>} : memref<8x1xf32, #tpu.memory_space<vmem>>, vector<8x1xf32>,
    %c0_15 = arith.constant 0 : index
    %c0_16 = arith.constant 0 : index
    %22 = vector.load %arg7[%c0_15, %c0_16] : memref<8x128xf32, #tpu.memory_space<vmem>>, vector<8x128xf32>
    %23 = vector.broadcast %12 : vector<8x1xf32> to vector<8x128xf32>
    %24 = arith.mulf %23, %22 : vector<8x128xf32>
    %25 = vector.shape_cast %15 : vector<8x16xf32> to vector<8x16x1xf32>
    %26 = vector.broadcast %25 : vector<8x16x1xf32> to vector<8x16x128xf32>
    %27 = arith.mulf %26, %4 : vector<8x16x128xf32>
    %cst_17 = arith.constant dense<0.000000e+00> : vector<8x128xf32>
    %28 = vector.multi_reduction <add>, %27, %cst_17 [1] : vector<8x16x128xf32> to vector<8x128xf32>
    %29 = arith.addf %24, %28 : vector<8x128xf32>
    %c0_18 = arith.constant 0 : index
    %c0_19 = arith.constant 0 : index
    %30 = vector.load %arg7[%c0_18, %c0_19] : memref<8x128xf32, #tpu.memory_space<vmem>>, vector<8x128xf32>
    tpu.vector_store %arg7[%c0_18, %c0_19], %29 {strides = array<i32>} : memref<8x128xf32, #tpu.memory_space<vmem>>, vector<8x128xf32>,
    %c0_20 = arith.constant 0 : index
    %c0_21 = arith.constant 0 : index
    %31 = vector.load %arg5[%c0_20, %c0_21] : memref<8x1xf32, #tpu.memory_space<vmem>>, vector<8x1xf32>
    tpu.vector_store %arg5[%c0_20, %c0_21], %10 {strides = array<i32>} : memref<8x1xf32, #tpu.memory_space<vmem>>, vector<8x1xf32>,
    %c0_i32_22 = arith.constant 0 : i32
    %32 = arith.cmpi eq, %arg1, %c0_i32_22 : i32
    %33 = arith.extui %32 : i1 to i32
    %c0_i32_23 = arith.constant 0 : i32
    %34 = arith.cmpi ne, %33, %c0_i32_23 : i32
    scf.if %34 {
      %c0_24 = arith.constant 0 : index
      %c0_25 = arith.constant 0 : index
      %35 = vector.load %arg6[%c0_24, %c0_25] : memref<8x1xf32, #tpu.memory_space<vmem>>, vector<8x1xf32>
      %36 = tpu.reciprocal %35 : vector<8x1xf32> -> vector<8x1xf32>
      %c0_26 = arith.constant 0 : index
      %c0_27 = arith.constant 0 : index
      %37 = vector.load %arg7[%c0_26, %c0_27] : memref<8x128xf32, #tpu.memory_space<vmem>>, vector<8x128xf32>
      %38 = vector.broadcast %36 : vector<8x1xf32> to vector<8x128xf32>
      %39 = arith.mulf %37, %38 : vector<8x128xf32>
      %c0_28 = arith.constant 0 : index
      %c0_29 = arith.constant 0 : index
      %40 = vector.load %arg4[%c0_28, %c0_29] : memref<8x128xf32, #tpu.memory_space<vmem>>, vector<8x128xf32>
      tpu.vector_store %arg4[%c0_28, %c0_29], %39 {strides = array<i32>} : memref<8x128xf32, #tpu.memory_space<vmem>>, vector<8x128xf32>,
    } else {
    }
    return
  }
  func.func @transform_0(%arg0: i32, %arg1: i32) -> (i32, i32, i32) {
    %c0_i32 = arith.constant 0 : i32
    %c0_i32_0 = arith.constant 0 : i32
    %c0_i32_1 = arith.constant 0 : i32
    return %arg0, %c0_i32, %c0_i32_0 : i32, i32, i32
  }
  func.func @transform_1(%arg0: i32, %arg1: i32) -> (i32, i32, i32) {
    %c0_i32 = arith.constant 0 : i32
    %c0_i32_0 = arith.constant 0 : i32
    return %arg0, %arg1, %c0_i32 : i32, i32, i32
  }
  func.func @transform_2(%arg0: i32, %arg1: i32) -> (i32, i32) {
    %c0_i32 = arith.constant 0 : i32
    %c0_i32_0 = arith.constant 0 : i32
    return %arg0, %c0_i32 : i32, i32
  }
}

</mosaic_0001>

<bundles_post_ra>
// kernel: textual_attention.1
= control target key start
LH: loop header
LB: loop body
LE: loop exit
PB: predicated region body
PF: predicated region fallthrough
CT: control target
= control target key end

     0   :  { %7 = vsyncpa [#allocation6], 0  ;;  %s1398_s0 = inlined_call_operand.hbm [shape: f32[8,8,128], index: 0, kind: input, shape index: {}]   ;;  %s1399_s1 = inlined_call_operand.hbm [shape: f32[8,16,128], index: 1, kind: input, shape index: {}]   ;;  %s1400_s2 = inlined_call_operand.hbm [shape: f32[8,128], index: 2, kind: output, shape index: {}]  }
   0x1   :  { %8 = vsyncpa [#allocation9], 0 }
   0x2   :  { %9 = vsyncpa [#allocation7], 0  ;;  %s1217_s9 = smov [#allocation5]   ;;  %s1145_s13 = scalar_lea.hbm %s1398_s0, 1024 }
   0x3   :  { %s15_s10 = sshll.u32 %s1217_s9, 4  ;;  %p1146_p0 = scmp.ne.s32.totalorder %s1398_s0, %s1145_s13  ;;  %s16_s10 = int_to_ptr.vmem [resolvable:$true] %s15_s10 }
   0x4   :  { %p1149_p1 = scmp.lt.u32.totalorder %s1145_s13, %s1398_s0 }
   0x6   :  { %p1151_p2 = pnand %p1149_p1, %p1146_p0 }
   0x8   :  { %1154 = shalt.err (!%p1151_p2)
}
   0x9   :  { %s1155_s18 = scalar_lea.vmem %s16_s10, 1024  ;;  %p1160_p4 = scmp.lt.s32.totalorder %s16_s10, %s16_s10 }
   0xa   :  { %p1156_p3 = scmp.ne.s32.totalorder %s16_s10, %s1155_s18  ;;  %p1161_p5 = scmp.lt.s32.totalorder %s1155_s18, %s1155_s18 }
   0xc   :  { %p1162_p6 = por %p1161_p5, %p1160_p4 }
   0xe   :  { %p1163_p7 = pnand %p1162_p6, %p1156_p3 }
  0x10   :  { %1166 = shalt.err (!%p1163_p7)
}
  0x11   :  { %s1218_s19 = smov 128   ;;  %s1219_s20 = smov 8  }
  0x12   :  { %21 = dma.hbm_to_vmem [thread:$0]  %s1398_s0, 1024, %s16_s10, [#allocation6], %s1218_s19, %s1218_s19, %s1219_s20  }
  0x13   :  { %s1220_s23 = smov [#allocation8]   ;;  %s1167_s27 = scalar_lea.hbm %s1399_s1, 2048 }
  0x14   :  { %s27_s24 = sshll.u32 %s1220_s23, 4  ;;  %p1168_p8 = scmp.ne.s32.totalorder %s1399_s1, %s1167_s27  ;;  %s28_s24 = int_to_ptr.vmem [resolvable:$true] %s27_s24 }
  0x15   :  { %p1171_p9 = scmp.lt.u32.totalorder %s1167_s27, %s1399_s1 }
  0x17   :  { %p1173_p10 = pnand %p1171_p9, %p1168_p8 }
  0x19   :  { %1176 = shalt.err (!%p1173_p10)
}
  0x1a   :  { %s1177_s4 = scalar_lea.vmem %s28_s24, 2048  ;;  %p1182_p12 = scmp.lt.s32.totalorder %s28_s24, %s28_s24 }
  0x1b   :  { %p1178_p11 = scmp.ne.s32.totalorder %s28_s24, %s1177_s4  ;;  %p1183_p13 = scmp.lt.s32.totalorder %s1177_s4, %s1177_s4 }
  0x1d   :  { %p1184_p0 = por %p1183_p13, %p1182_p12 }
  0x1f   :  { %p1185_p1 = pnand %p1184_p0, %p1178_p11 }
  0x21   :  { %1188 = shalt.err (!%p1185_p1)
}
  0x22   :  { %33 = dma.hbm_to_vmem [thread:$0]  %s1399_s1, 2048, %s28_s24, [#allocation9], %s1218_s19, %s1218_s19, %s1219_s20  }
  0x23   :  { %1211 = dma.done.wait [#allocation6], 1024  }
  0x24   :  { %1212 = vsyncadd [#allocation6], 4294966272 }
  0x25   :  { %1213 = dma.done.wait [#allocation9], 2048  }
  0x26   :  { %1214 = vsyncadd [#allocation9], 4294965248  ;;  %v1221_v0 = vmov 0.0|0.0   ;;  %vm1222_vm0 = vmmov 0   ;;  %v1223_v1 = vmov 0.0   ;;  %v1270_v2 = vld [vmem:[#allocation8] sm:$0xff] }
  0x27   :  { %1089 = vmatprep.subr.bf16.mxu0 %v1221_v0  ;;  %1092 = vmatprep.subr.bf16.mxu1 %v1221_v0  ;;  %v1272_v3 = vld [vmem:[#allocation8 + $0x8] sm:$0xff]  ;;  %v1274_v4 = vld [vmem:[#allocation8 + $0x10] sm:$0xff]  ;;  %v1278_v6 = vld [vmem:[#allocation8 + $0x18] sm:$0xff]  ;;  %vm44_vm1 = vcmask 7168   ;;  %v1224_v34 = vmov -inf   ;;  %vm632_vm2 = vcmask 130048  }
  0x28   :  { %1037 = vmatprep.mubr.msk.f32.mxu0 %vm1222_vm0, %v1223_v1  ;;  %1044 = vmatprep.mubr.msk.f32.mxu1 %vm1222_vm0, %v1223_v1  ;;  %v1090_v5 = vpack.c.bf16 %v1272_v3, %v1270_v2  ;;  %v1093_v7 = vpack.c.bf16 %v1278_v6, %v1274_v4  ;;  %v1282_v8 = vld [vmem:[#allocation8 + $0x20] sm:$0xff]  ;;  %v1284_v9 = vld [vmem:[#allocation8 + $0x28] sm:$0xff]  ;;  %v1286_v10 = vld [vmem:[#allocation8 + $0x30] sm:$0xff]  ;;  %45 = vst.msk [vmem:[#allocation2] sm:$0xff] %vm44_vm1, %v1224_v34  ;;  %vm698_vm3 = vcmask 1041409   ;;  %vm700_vm4 = vcmask 1042434  }
  0x29   :  { %v1288_v11 = vld [vmem:[#allocation8 + $0x38] sm:$0xff]  ;;  %v48_v12 = vld [vmem:[#allocation5] sm:$0xff]  ;;  %v1096_v13 = vpack.c.bf16 %v1284_v9, %v1282_v8  ;;  %v49_v14 = vld [vmem:[#allocation5 + $0x8] sm:$0xff]  ;;  %46 = vst.msk [vmem:[#allocation3] sm:$0xff] %vm44_vm1, %v1223_v1  ;;  %vm702_vm5 = vcmask 1043459   ;;  %vm704_vm6 = vcmask 1044484  }
  0x2a   :  { %1091 = vmatpush3.bf16.xpose.msra.mxu0 %v1090_v5  ;;  %1094 = vmatpush3.bf16.xpose.msra.mxu1 %v1093_v7  ;;  %v1099_v15 = vpack.c.bf16 %v1288_v11, %v1286_v10  ;;  %v1296_v16 = vld [vmem:[#allocation8 + $0x40] sm:$0xff]  ;;  %v1298_v17 = vld [vmem:[#allocation8 + $0x48] sm:$0xff]  ;;  %v1302_v18 = vld [vmem:[#allocation8 + $0x50] sm:$0xff]  ;;  %vm706_vm7 = vcmask 1045509   ;;  %vm708_vm8 = vcmask 1046534   ;;  %vm710_vm9 = vcmask 1047559  }
  0x2b   :  { %1095 = vmatprep.subr.bf16.mxu0 %v1221_v0  ;;  %1098 = vmatprep.subr.bf16.mxu1 %v1221_v0  ;;  %v1304_v19 = vld [vmem:[#allocation8 + $0x58] sm:$0xff]  ;;  %v50_v20 = vld [vmem:[#allocation5 + $0x10] sm:$0xff]  ;;  %v1102_v21 = vpack.c.bf16 %v1298_v17, %v1296_v16  ;;  %v1312_v24 = vld [vmem:[#allocation8 + $0x60] sm:$0xff]  ;;  %s1226_s1 = smov [#allocation10]  }
  0x2c   :  { %v51_v22 = vld [vmem:[#allocation5 + $0x18] sm:$0xff]  ;;  %v1105_v23 = vpack.c.bf16 %v1304_v19, %v1302_v18  ;;  %v1314_v25 = vld [vmem:[#allocation8 + $0x68] sm:$0xff]  ;;  %v1318_v26 = vld [vmem:[#allocation8 + $0x70] sm:$0xff]  ;;  %s999_s6 = sshll.u32 %s1226_s1, 4  ;;  %s1000_s6 = int_to_ptr.vmem [resolvable:$true] %s999_s6 }
  0x2d   :  { %v1320_v27 = vld [vmem:[#allocation8 + $0x78] sm:$0xff]  ;;  %v52_v28 = vld [vmem:[#allocation5 + $0x20] sm:$0xff]  ;;  %v1108_v29 = vpack.c.bf16 %v1314_v25, %v1312_v24  ;;  %v53_v30 = vld [vmem:[#allocation5 + $0x28] sm:$0xff]  ;;  %s1189_s7 = scalar_lea.vmem %s1000_s6, 128  ;;  %p1194_p3 = scmp.lt.s32.totalorder %s1000_s6, %s1000_s6 }
  0x2e   :  { %v1111_v31 = vpack.c.bf16 %v1320_v27, %v1318_v26  ;;  %v54_v32 = vld [vmem:[#allocation5 + $0x30] sm:$0xff]  ;;  %v55_v33 = vld [vmem:[#allocation5 + $0x38] sm:$0xff]  ;;  %p1190_p2 = scmp.ne.s32.totalorder %s1000_s6, %s1189_s7  ;;  %p1195_p4 = scmp.lt.s32.totalorder %s1189_s7, %s1189_s7 }
  0x30   :  { %p1196_p5 = por %p1195_p4, %p1194_p3 }
  0x31   :  { %1038 = vmatmul.mubr.f32.vlgmr.msra.gmra.mrb[0].mxu0 %v48_v12  ;;  %1045 = vmatmul.mubr.f32.vlgmr.msra.gmra.mrb[0].mxu1 %v49_v14 }
  0x32   :  { %1097 = vmatpush3.bf16.xpose.msra.mxu0 %v1096_v13  ;;  %1100 = vmatpush3.bf16.xpose.msra.mxu1 %v1099_v15  ;;  %p1197_p6 = pnand %p1196_p5, %p1190_p2 }
  0x33   :  { %1051 = vmatprep.mubr.msk.f32.mxu0 %vm1222_vm0, %v1223_v1  ;;  %1058 = vmatprep.mubr.msk.f32.mxu1 %vm1222_vm0, %v1223_v1 }
  0x34   :  { %1101 = vmatprep.subr.bf16.mxu0 %v1221_v0  ;;  %1104 = vmatprep.subr.bf16.mxu1 %v1221_v0 }
  0x39   :  { %1052 = vmatmul.mubr.f32.vlgmr.msra.gmra.mrb[2].mxu0 %v50_v20  ;;  %1059 = vmatmul.mubr.f32.vlgmr.msra.gmra.mrb[2].mxu1 %v51_v22 }
  0x3a   :  { %1103 = vmatpush3.bf16.xpose.msra.mxu0 %v1102_v21  ;;  %1106 = vmatpush3.bf16.xpose.msra.mxu1 %v1105_v23 }
  0x3b   :  { %1065 = vmatprep.mubr.msk.f32.mxu0 %vm1222_vm0, %v1223_v1  ;;  %1072 = vmatprep.mubr.msk.f32.mxu1 %vm1222_vm0, %v1223_v1 }
  0x3c   :  { %1107 = vmatprep.subr.bf16.mxu0 %v1221_v0  ;;  %1110 = vmatprep.subr.bf16.mxu1 %v1221_v0 }
  0x41   :  { %1066 = vmatmul.mubr.f32.vlgmr.msra.gmra.mrb[4].mxu0 %v52_v28  ;;  %1073 = vmatmul.mubr.f32.vlgmr.msra.gmra.mrb[4].mxu1 %v53_v30 }
  0x42   :  { %1109 = vmatpush3.bf16.xpose.msra.mxu0 %v1108_v29  ;;  %1112 = vmatpush3.bf16.xpose.msra.mxu1 %v1111_v31 }
  0x43   :  { %1079 = vmatprep.mubr.msk.f32.mxu0 %vm1222_vm0, %v1223_v1  ;;  %1086 = vmatprep.mubr.msk.f32.mxu1 %vm1222_vm0, %v1223_v1 }
  0x49   :  { %1080 = vmatmul.mubr.f32.vlgmr.msra.gmra.mrb[6].mxu0 %v54_v32  ;;  %1087 = vmatmul.mubr.f32.vlgmr.msra.gmra.mrb[6].mxu1 %v55_v33 }
 0x104   :  { %v138_v35 = vpop.f32.mrb[0].mxu0  ;;  %v208_v37 = vpop.f32.mrb[0].mxu1 }
 0x105   :  { %v633_v36 = vsel %vm632_vm2, %v138_v35, -inf  ;;  %v1039_v38 = vpop.f32.mrb[1].mxu0  ;;  %v640_v39 = vsel %vm632_vm2, %v208_v37, -inf  ;;  %v1046_v40 = vpop.f32.mrb[1].mxu1 }
 0x106   :  { %v634_v41 = vrot.slane %v633_v36, 4  ;;  %v641_v42 = vrot.slane %v640_v39, 4 }
 0x108   :  { %v635_v43 = vmax.f32 %v633_v36, %v634_v41  ;;  %v642_v45 = vmax.f32 %v640_v39, %v641_v42 }
 0x10a   :  { %v636_v53 = vrot.slane %v635_v43, 2  ;;  %v643_v55 = vrot.slane %v642_v45, 2 }
 0x10c   :  { %v278_v44 = vpop.f32.mrb[2].mxu0  ;;  %v348_v47 = vpop.f32.mrb[2].mxu1  ;;  %v637_v58 = vmax.f32 %v635_v43, %v636_v53  ;;  %v644_v60 = vmax.f32 %v642_v45, %v643_v55 }
 0x10d   :  { %v647_v46 = vsel %vm632_vm2, %v278_v44, -inf  ;;  %v1053_v48 = vpop.f32.mrb[3].mxu0  ;;  %v654_v50 = vsel %vm632_vm2, %v348_v47, -inf  ;;  %v1060_v51 = vpop.f32.mrb[3].mxu1 }
 0x10e   :  { %v648_v49 = vrot.slane %v647_v46, 4  ;;  %v655_v52 = vrot.slane %v654_v50, 4  ;;  %v638_v14 = vrot.slane %v637_v58, 1  ;;  %v645_v20 = vrot.slane %v644_v60, 1 }
 0x110   :  { %v649_v54 = vmax.f32 %v647_v46, %v648_v49  ;;  %v656_v56 = vmax.f32 %v654_v50, %v655_v52  ;;  %v1339_v30 = vmax.f32 %v637_v58, %v638_v14  ;;  %v646_v33 = vmax.f32 %v644_v60, %v645_v20 }
 0x112   :  { %v650_v57 = vrot.slane %v649_v54, 2  ;;  %v657_v61 = vrot.slane %v656_v56, 2  ;;  %v699_v46 = vsel %vm698_vm3, %v646_v33, %v1339_v30 }
 0x114   :  { %v418_v59 = vpop.f32.mrb[4].mxu0  ;;  %v488_v63 = vpop.f32.mrb[4].mxu1  ;;  %v651_v1 = vmax.f32 %v649_v54, %v650_v57  ;;  %v658_v21 = vmax.f32 %v656_v56, %v657_v61 }
 0x115   :  { %v661_v62 = vsel %vm632_vm2, %v418_v59, -inf  ;;  %v1067_v0 = vpop.f32.mrb[5].mxu0  ;;  %v668_v7 = vsel %vm632_vm2, %v488_v63, -inf  ;;  %v1074_v12 = vpop.f32.mrb[5].mxu1 }
 0x116   :  { %v662_v5 = vrot.slane %v661_v62, 4  ;;  %v669_v13 = vrot.slane %v668_v7, 4  ;;  %v652_v23 = vrot.slane %v651_v1, 1  ;;  %v659_v34 = vrot.slane %v658_v21, 1  ;;  %v689_v12 = vld [vmem:[#allocation2] sm:$0xff] }
 0x118   :  { %v663_v15 = vmax.f32 %v661_v62, %v662_v5  ;;  %v670_v22 = vmax.f32 %v668_v7, %v669_v13  ;;  %v653_v39 = vmax.f32 %v651_v1, %v652_v23  ;;  %v660_v47 = vmax.f32 %v658_v21, %v659_v34 }
 0x119   :  { %v1225_v7 = vmov 0  }
 0x11a   :  { %v664_v28 = vrot.slane %v663_v15, 2  ;;  %v671_v29 = vrot.slane %v670_v22, 2  ;;  %v701_v50 = vsel %vm700_vm4, %v653_v39, %v699_v46  ;;  %1123 = vset.pattern.permute.xlu0 %v1225_v7  ;;  %1124 = vset.pattern.permute.xlu1 %v1225_v7 }
 0x11b   :  { %v703_v57 = vsel %vm702_vm5, %v660_v47, %v701_v50 }
 0x11c   :  { %v665_v31 = vmax.f32 %v663_v15, %v664_v28  ;;  %v558_v32 = vpop.f32.mrb[6].mxu0  ;;  %v672_v35 = vmax.f32 %v670_v22, %v671_v29  ;;  %v628_v37 = vpop.f32.mrb[6].mxu1 }
 0x11d   :  { %v675_v36 = vsel %vm632_vm2, %v558_v32, -inf  ;;  %v1081_v38 = vpop.f32.mrb[7].mxu0  ;;  %v682_v42 = vsel %vm632_vm2, %v628_v37, -inf  ;;  %v1088_v43 = vpop.f32.mrb[7].mxu1 }
 0x11e   :  { %v666_v40 = vrot.slane %v665_v31, 1  ;;  %v676_v41 = vrot.slane %v675_v36, 4  ;;  %v683_v44 = vrot.slane %v682_v42, 4  ;;  %v673_v48 = vrot.slane %v672_v35, 1 }
 0x120   :  { %v677_v45 = vmax.f32 %v675_v36, %v676_v41  ;;  %v684_v49 = vmax.f32 %v682_v42, %v683_v44  ;;  %v667_v51 = vmax.f32 %v665_v31, %v666_v40  ;;  %v674_v55 = vmax.f32 %v672_v35, %v673_v48 }
 0x122   :  { %v678_v52 = vrot.slane %v677_v45, 2  ;;  %v685_v53 = vrot.slane %v684_v49, 2  ;;  %v705_v59 = vsel %vm704_vm6, %v667_v51, %v703_v57 }
 0x123   :  { %v707_v63 = vsel %vm706_vm7, %v674_v55, %v705_v59 }
 0x124   :  { %v679_v54 = vmax.f32 %v677_v45, %v678_v52  ;;  %v686_v56 = vmax.f32 %v684_v49, %v685_v53 }
 0x126   :  { %v680_v58 = vrot.slane %v679_v54, 1  ;;  %v687_v60 = vrot.slane %v686_v56, 1 }
 0x128   :  { %v681_v61 = vmax.f32 %v679_v54, %v680_v58  ;;  %v688_v62 = vmax.f32 %v686_v56, %v687_v60 }
 0x12a   :  { %v709_v0 = vsel %vm708_vm8, %v681_v61, %v707_v63 }
 0x12b   :  { %v711_v1 = vsel %vm710_vm9, %v688_v62, %v709_v0 }
 0x12c   :  { %v713_v5 = vsel %vm632_vm2, %v711_v1, -inf }
 0x12d   :  { %714 = vmax.xlane.f32.xlu0 %v713_v5 }
 0x1ba   :  { %v715_v13 = vpop.xlane.xlu0 %714 }
 0x1bb   :  { %v716_v14 = vmax.f32 %v689_v12, %v715_v13 }
 0x1bd   :  { %v717_v15 = vsub.f32 %v689_v12, %v716_v14  ;;  %979 = vst.msk [vmem:[#allocation2] sm:$0xff] %vm44_vm1, %v716_v14  ;;  %722 = vperm.xlu0 %1123, %v716_v14  }
 0x1bf   :  { %v718_v14 = vmul.f32 1.442695, %v717_v15 }
 0x23c   :  { %v723_v20 = vpop.permute.xlu0 %722 }
 0x23d   :  { %v724_v21 = vrot.slane %v723_v20, 1  ;;  %v725_v22 = vrot.slane %v723_v20, 2  ;;  %v726_v23 = vrot.slane %v723_v20, 3  ;;  %v739_v28 = vsub.f32 %v1339_v30, %v723_v20 }
 0x23e   :  { %v727_v29 = vrot.slane %v723_v20, 4  ;;  %v728_v31 = vrot.slane %v723_v20, 5  ;;  %v729_v32 = vrot.slane %v723_v20, 6  ;;  %v730_v34 = vrot.slane %v723_v20, 7 }
 0x23f   :  { %v740_v35 = vsub.f32 %v646_v33, %v724_v21  ;;  %v741_v36 = vsub.f32 %v653_v39, %v725_v22  ;;  %v742_v37 = vsub.f32 %v660_v47, %v726_v23  ;;  %v747_v38 = vmul.f32 1.442695, %v739_v28 }
 0x240   :  { %v743_v40 = vsub.f32 %v667_v51, %v727_v29  ;;  %v744_v41 = vsub.f32 %v674_v55, %v728_v31  ;;  %v745_v42 = vsub.f32 %v681_v61, %v729_v32  ;;  %v746_v46 = vsub.f32 %v688_v62, %v730_v34 }
 0x241   :  { %v749_v43 = vmul.f32 1.442695, %v740_v35  ;;  %v751_v44 = vmul.f32 1.442695, %v741_v36  ;;  %v753_v45 = vmul.f32 1.442695, %v742_v37  ;;  %1125 = vpow2.f32 %v747_v38 }
 0x242   :  { %v755_v48 = vmul.f32 1.442695, %v743_v40  ;;  %v757_v49 = vmul.f32 1.442695, %v744_v41  ;;  %v759_v30 = vmul.f32 1.442695, %v745_v42  ;;  %v801_v33 = vlaneseq }
 0x243   :  { %1127 = vpow2.f32 %v749_v43  ;;  %v761_v50 = vmul.f32 1.442695, %v746_v46  ;;  %v763_v38 = vld [vmem:[#allocation3] sm:$0xff] }
 0x244   :  { %1129 = vpow2.f32 %v751_v44  ;;  %v802_v39 = vshrl.u32 %v801_v33, 7 }
 0x245   :  { %1131 = vpow2.f32 %v753_v45 }
 0x246   :  { %1133 = vpow2.f32 %v755_v48  ;;  %v803_v55 = vsub.s32 0, %v802_v39 }
 0x247   :  { %1135 = vpow2.f32 %v757_v49 }
 0x248   :  { %1137 = vpow2.f32 %v759_v30 }
 0x249   :  { %1139 = vpow2.f32 %v761_v50 }
 0x24a   :  { %1141 = vpow2.f32 %v718_v14 }
 0x24b   :  { %v1126_v47 = vpop.eup %1125 }
 0x24c   :  { %v804_v15 = vrot.slane %v1126_v47, %v803_v55 }
 0x24d   :  { %v1128_v51 = vpop.eup %1127 }
 0x24e   :  { %v1130_v52 = vpop.eup %1129  ;;  %v773_v53 = vrot.slane %v1128_v51, 7  ;;  %v815_v35 = vrot.slane %v1128_v51, %v803_v55 }
 0x24f   :  { %v1132_v54 = vpop.eup %1131  ;;  %v775_v56 = vrot.slane %v1130_v52, 6  ;;  %v826_v36 = vrot.slane %v1130_v52, %v803_v55 }
 0x250   :  { %v1134_v57 = vpop.eup %1133  ;;  %v774_v58 = vsel %vm698_vm3, %v773_v53, %v1126_v47  ;;  %v777_v59 = vrot.slane %v1132_v54, 5  ;;  %v837_v37 = vrot.slane %v1132_v54, %v803_v55 }
 0x251   :  { %v1136_v60 = vpop.eup %1135  ;;  %v848_v61 = vrot.slane %v1134_v57, %v803_v55  ;;  %v776_v62 = vsel %vm700_vm4, %v775_v56, %v774_v58  ;;  %v779_v63 = vrot.slane %v1134_v57, 4 }
 0x252   :  { %v1138_v0 = vpop.eup %1137  ;;  %v778_v1 = vsel %vm702_vm5, %v777_v59, %v776_v62  ;;  %v781_v5 = vrot.slane %v1136_v60, 3  ;;  %v859_v22 = vrot.slane %v1136_v60, %v803_v55 }
 0x253   :  { %v1140_v7 = vpop.eup %1139  ;;  %850 = vbcast.lane.b32.xlu0 %v848_v61, 256  ;;  %v780_v12 = vsel %vm704_vm6, %v779_v63, %v778_v1  ;;  %v783_v13 = vrot.slane %v1138_v0, 2  ;;  %v870_v31 = vrot.slane %v1138_v0, %v803_v55 }
 0x254   :  { %v782_v20 = vsel %vm706_vm7, %v781_v5, %v780_v12  ;;  %v785_v21 = vrot.slane %v1140_v7, 1  ;;  %v881_v32 = vrot.slane %v1140_v7, %v803_v55  ;;  %v1142_v34 = vpop.eup %1141 }
 0x255   :  { %v784_v23 = vsel %vm708_vm8, %v783_v13, %v782_v20  ;;  %v764_v40 = vmul.f32 %v1142_v34, %v763_v38 }
 0x256   :  { %v786_v28 = vsel %vm710_vm9, %v785_v21, %v784_v23 }
 0x257   :  { %861 = vbcast.lane.b32.xlu0 %v859_v22, 256  ;;  %v788_v29 = vsel %vm632_vm2, %v786_v28, 0.0 }
 0x258   :  { %789 = vadd.xlane.f32.xlu1 %v788_v29 }
 0x25b   :  { %872 = vbcast.lane.b32.xlu0 %v870_v31, 256 }
 0x25f   :  { %883 = vbcast.lane.b32.xlu0 %v881_v32, 256 }
 0x263   :  { %797 = vperm.xlu0 %1123, %v1142_v34  }
 0x269   :  { %806 = vbcast.lane.b32.xlu1 %v804_v15, 256 }
 0x26d   :  { %810 = vbcast.lane.b32.xlu1 %v804_v15, 264 }
 0x271   :  { %817 = vbcast.lane.b32.xlu1 %v815_v35, 256 }
 0x275   :  { %821 = vbcast.lane.b32.xlu1 %v815_v35, 264 }
 0x279   :  { %828 = vbcast.lane.b32.xlu1 %v826_v36, 256 }
 0x27d   :  { %832 = vbcast.lane.b32.xlu1 %v826_v36, 264 }
 0x281   :  { %839 = vbcast.lane.b32.xlu1 %v837_v37, 256 }
 0x285   :  { %843 = vbcast.lane.b32.xlu1 %v837_v37, 264 }
 0x289   :  { %854 = vbcast.lane.b32.xlu1 %v848_v61, 264 }
 0x28d   :  { %865 = vbcast.lane.b32.xlu1 %v859_v22, 264 }
 0x291   :  { %876 = vbcast.lane.b32.xlu1 %v870_v31, 264 }
 0x295   :  { %887 = vbcast.lane.b32.xlu1 %v881_v32, 264 }
 0x2c5   :  { %v851_v51 = vpop.permute.xlu0 %850 }
 0x2c9   :  { %v862_v53 = vpop.permute.xlu0 %861 }
 0x2cd   :  { %v873_v55 = vpop.permute.xlu0 %872 }
 0x2ce   :  { %v901_v13 = vmul.f32 %v873_v55, %v1312_v24 }
 0x2d1   :  { %v884_v7 = vpop.permute.xlu0 %883 }
 0x2d2   :  { %v903_v14 = vmul.f32 %v884_v7, %v1318_v26 }
 0x2e5   :  { %v790_v41 = vpop.xlane.xlu1 %789 }
 0x2e6   :  { %v791_v42 = vadd.f32 %v790_v41, %v764_v40 }
 0x2e8   :  { %793 = vst.msk [vmem:[#allocation3] sm:$0xff] %vm44_vm1, %v791_v42 }
 0x2e9   :  { %v807_v45 = vpop.permute.xlu1 %806 }
 0x2ea   :  { %v889_v0 = vmul.f32 %v807_v45, %v1270_v2 }
 0x2ed   :  { %v811_v46 = vpop.permute.xlu1 %810 }
 0x2ee   :  { %v890_v58 = vmul.f32 %v811_v46, %v1272_v3 }
 0x2ef   :  { %v983_v43 = vld [vmem:[#allocation3] sm:$0xff] }
 0x2f0   :  { %1143 = vrcp.f32 %v983_v43  ;;  %v905_v12 = vadd.f32 %v890_v58, %v889_v0 }
 0x2f1   :  { %v818_v48 = vpop.permute.xlu1 %817 }
 0x2f2   :  { %v891_v59 = vmul.f32 %v818_v48, %v1274_v4 }
 0x2f5   :  { %v822_v49 = vpop.permute.xlu1 %821 }
 0x2f6   :  { %v892_v56 = vmul.f32 %v822_v49, %v1278_v6 }
 0x2f8   :  { %v912_v1 = vadd.f32 %v892_v56, %v891_v59 }
 0x2f9   :  { %v829_v30 = vpop.permute.xlu1 %828 }
 0x2fa   :  { %v1144_v44 = vpop.eup %1143  ;;  %v893_v61 = vmul.f32 %v829_v30, %v1282_v8 }
 0x2fb   :  { %988 = vperm.xlu1 %1124, %v1144_v44  }
 0x2fd   :  { %v833_v50 = vpop.permute.xlu1 %832 }
 0x2fe   :  { %v894_v57 = vmul.f32 %v833_v50, %v1284_v9  ;;  %v897_v9 = vmul.f32 %v851_v51, %v1296_v16  ;;  %v906_v16 = vrot.slane %v905_v12, 4 }
 0x300   :  { %v919_v3 = vadd.f32 %v894_v57, %v893_v61  ;;  %v907_v32 = vadd.f32 %v906_v16, %v905_v12 }
 0x301   :  { %v840_v33 = vpop.permute.xlu1 %839 }
 0x302   :  { %v895_v5 = vmul.f32 %v840_v33, %v1286_v10  ;;  %v913_v10 = vrot.slane %v912_v1, 4  ;;  %v908_v37 = vrot.slane %v907_v32, 2 }
 0x304   :  { %v909_v46 = vadd.f32 %v908_v37, %v907_v32 }
 0x305   :  { %v844_v39 = vpop.permute.xlu1 %843 }
 0x306   :  { %v896_v60 = vmul.f32 %v844_v39, %v1288_v11  ;;  %v899_v11 = vmul.f32 %v862_v53, %v1302_v18  ;;  %v910_v51 = vrot.slane %v909_v46, 1 }
 0x308   :  { %v926_v8 = vadd.f32 %v896_v60, %v895_v5  ;;  %v911_v59 = vadd.f32 %v910_v51, %v909_v46 }
 0x309   :  { %v855_v47 = vpop.permute.xlu1 %854 }
 0x30a   :  { %v898_v62 = vmul.f32 %v855_v47, %v1298_v17  ;;  %v927_v22 = vrot.slane %v926_v8, 4 }
 0x30c   :  { %v933_v2 = vadd.f32 %v898_v62, %v897_v9  ;;  %v928_v34 = vadd.f32 %v927_v22, %v926_v8 }
 0x30d   :  { %v866_v52 = vpop.permute.xlu1 %865 }
 0x30e   :  { %v900_v6 = vmul.f32 %v866_v52, %v1304_v19  ;;  %v920_v19 = vrot.slane %v919_v3, 4  ;;  %v934_v28 = vrot.slane %v933_v2, 4  ;;  %v929_v38 = vrot.slane %v928_v34, 2 }
 0x310   :  { %v940_v20 = vadd.f32 %v900_v6, %v899_v11  ;;  %v921_v18 = vadd.f32 %v920_v19, %v919_v3  ;;  %v935_v15 = vadd.f32 %v934_v28, %v933_v2  ;;  %v930_v48 = vadd.f32 %v929_v38, %v928_v34  ;;  %v798_v3 = vpop.permute.xlu0 %797 }
 0x311   :  { %v877_v54 = vpop.permute.xlu1 %876  ;;  %v800_v8 = vmul.f32 0.0, %v798_v3 }
 0x312   :  { %v902_v4 = vmul.f32 %v877_v54, %v1314_v25  ;;  %v914_v25 = vadd.f32 %v913_v10, %v912_v1  ;;  %v941_v29 = vrot.slane %v940_v20, 4  ;;  %v922_v36 = vrot.slane %v921_v18, 2 }
 0x313   :  { %v936_v41 = vrot.slane %v935_v15, 2  ;;  %v931_v52 = vrot.slane %v930_v48, 1 }
 0x314   :  { %v947_v21 = vadd.f32 %v902_v4, %v901_v13  ;;  %v915_v24 = vrot.slane %v914_v25, 2  ;;  %v942_v35 = vadd.f32 %v941_v29, %v940_v20  ;;  %v923_v44 = vadd.f32 %v922_v36, %v921_v18 }
 0x315   :  { %v888_v63 = vpop.permute.xlu1 %887  ;;  %v937_v30 = vadd.f32 %v936_v41, %v935_v15  ;;  %v932_v60 = vadd.f32 %v931_v52, %v930_v48 }
 0x316   :  { %v904_v17 = vmul.f32 %v888_v63, %v1320_v27  ;;  %v948_v31 = vrot.slane %v947_v21, 4  ;;  %v916_v42 = vadd.f32 %v915_v24, %v914_v25  ;;  %v943_v43 = vrot.slane %v942_v35, 2 }
 0x317   :  { %v924_v39 = vrot.slane %v923_v44, 1  ;;  %v938_v54 = vrot.slane %v937_v30, 1 }
 0x318   :  { %v954_v23 = vadd.f32 %v904_v17, %v903_v14  ;;  %v949_v26 = vadd.f32 %v948_v31, %v947_v21  ;;  %v917_v50 = vrot.slane %v916_v42, 1  ;;  %v944_v33 = vadd.f32 %v943_v43, %v942_v35 }
 0x319   :  { %v925_v57 = vadd.f32 %v924_v39, %v923_v44  ;;  %v939_v62 = vadd.f32 %v938_v54, %v937_v30 }
 0x31a   :  { %v955_v27 = vrot.slane %v954_v23, 4  ;;  %v950_v45 = vrot.slane %v949_v26, 2  ;;  %v918_v55 = vadd.f32 %v917_v50, %v916_v42  ;;  %v945_v56 = vrot.slane %v944_v33, 1 }
 0x31c   :  { %v956_v40 = vadd.f32 %v955_v27, %v954_v23  ;;  %v951_v47 = vadd.f32 %v950_v45, %v949_v26  ;;  %v969_v63 = vsel %vm698_vm3, %v918_v55, %v911_v59  ;;  %v946_v0 = vadd.f32 %v945_v56, %v944_v33 }
 0x31d   :  { %v970_v1 = vsel %vm700_vm4, %v925_v57, %v969_v63 }
 0x31e   :  { %v957_v49 = vrot.slane %v956_v40, 2  ;;  %v952_v58 = vrot.slane %v951_v47, 1  ;;  %v971_v9 = vsel %vm702_vm5, %v932_v60, %v970_v1 }
 0x31f   :  { %v972_v7 = vsel %vm704_vm6, %v939_v62, %v971_v9 }
 0x320   :  { %v958_v53 = vadd.f32 %v957_v49, %v956_v40  ;;  %v953_v5 = vadd.f32 %v952_v58, %v951_v47  ;;  %v973_v4 = vsel %vm706_vm7, %v946_v0, %v972_v7 }
 0x322   :  { %v959_v61 = vrot.slane %v958_v53, 1  ;;  %v974_v11 = vsel %vm708_vm8, %v953_v5, %v973_v4 }
 0x324   :  { %v960_v6 = vadd.f32 %v959_v61, %v958_v53 }
 0x326   :  { %v975_v12 = vsel %vm710_vm9, %v960_v6, %v974_v11 }
 0x327   :  { %v977_v17 = vadd.f32 %v975_v12, %v800_v8 }
 0x37a   :  { %v989_v13 = vpop.permute.xlu1 %988 }
 0x37b   :  { %v991_v2 = vmul.f32 %v989_v13, %v977_v17 }
 0x37d   :  { %992 = vst [vmem:[#allocation10] sm:$0xff] %v991_v2 }
 0x37e   :  { %1200 = shalt.err (!%p1197_p6)
}
 0x37f   :  { %s1201_s10 = scalar_lea.hbm %s1400_s2, 128 }
 0x380   :  { %p1202_p7 = scmp.ne.s32.totalorder %s1400_s2, %s1201_s10  ;;  %p1205_p8 = scmp.lt.u32.totalorder %s1201_s10, %s1400_s2 }
 0x382   :  { %p1207_p9 = pnand %p1205_p8, %p1202_p7 }
 0x384   :  { %1210 = shalt.err (!%p1207_p9)
}
 0x385   :  { %1002 = dma.vmem_to_hbm [thread:$0]  %s1000_s6, 128, %s1400_s2, [#allocation7]  }
 0x386   :  { %1215 = dma.done.wait [#allocation7], 128  }
 0x387   :  { %1216 = vsyncadd [#allocation7], 4294967168 }
 0x388   :  { %1006 = vsyncpa [#allocation6], 1 }
 0x389   :  { %1007 = vsyncpa [#allocation9], 1 }
 0x38a   :  { %1008 = vsyncpa [#allocation7], 1 }

</bundles_post_ra>
